<compile_context>
chip_gen: v6e
topology: v6e:2x2x1
jax: 0.10.0
libtpu: 0.0.40
codegen_flags: <defaults>
</compile_context>

<pallas_src>
import functools

import jax
import jax.numpy as jnp
from jax.experimental import pallas as pl
from jax.experimental.pallas import tpu as pltpu

SCALE = 10.0
VARIANCE_FOCUS = 0.85


def _num_tensorcores() -> int:
    """Best-effort TensorCore-per-chip count (2 only on megacore-style parts)."""
    try:
        info = pltpu.get_tpu_info()
    except Exception:
        return 1
    for attr in ("num_cores", "core_count", "num_tensorcores",
                 "tensorcore_count", "num_cores_per_chip", "cores_per_chip"):
        val = getattr(info, attr, None)
        if isinstance(val, int) and val >= 1:
            return min(2, val)
    return 1


def _silog_partial_kernel(pred_ref, gt_ref, cnt_ref, s1_ref, s2_ref, *,
                          rows, row_tile, lane, blocks_per_split, acc_rows,
                          need_row_mask, unroll):
    j = pl.program_id(1)

    # Output blocks stay resident across the reduction axis (same block index
    # for every j of a split) -> they are the accumulators (P3 pattern).
    @pl.when(j == 0)
    def _init():
        cnt_ref[...] = jnp.zeros_like(cnt_ref)
        s1_ref[...] = jnp.zeros_like(s1_ref)
        s2_ref[...] = jnp.zeros_like(s2_ref)

    logical_block = pl.program_id(0) * blocks_per_split + j
    n_groups = row_tile // acc_rows

    def accumulate(with_row_mask):
        block_row0 = logical_block * row_tile

        def group_step(g, carry):
            cnt_acc, s1_acc, s2_acc = carry
            start = pl.multiple_of(g * acc_rows, acc_rows)
            pred = pred_ref[pl.ds(start, acc_rows), :].astype(jnp.float32)
            gt = gt_ref[pl.ds(start, acc_rows), :].astype(jnp.float32)
            mask = (gt > 0.0) & (pred > 0.0)
            if with_row_mask:
                # Rows past the true row count (ragged last block / clamped
                # duplicate blocks of the core split) hold garbage -> mask by
                # global row index.
                local_row = jax.lax.broadcasted_iota(
                    jnp.int32, (acc_rows, lane), 0)
                mask = mask & (block_row0 + start + local_row < rows)
            # log(pred) - log(gt): both logs go to the EUP slot (idle while
            # HBM-bound); inner wheres keep masked-out lanes finite.
            ld = jnp.where(
                mask,
                jnp.log(jnp.where(mask, pred, 1.0))
                - jnp.log(jnp.where(mask, gt, 1.0)),
                0.0)
            return (cnt_acc + mask.astype(jnp.float32),
                    s1_acc + ld * ld,
                    s2_acc + ld)

        zeros = jnp.zeros((acc_rows, lane), jnp.float32)
        cnt_acc, s1_acc, s2_acc = jax.lax.fori_loop(
            0, n_groups, group_step, (zeros, zeros, zeros), unroll=unroll)
        cnt_ref[...] += cnt_acc
        s1_ref[...] += s1_acc
        s2_ref[...] += s2_acc

    if need_row_mask:
        # Only boundary blocks pay the per-element row-index mask.
        is_boundary = (logical_block + 1) * row_tile > rows

        @pl.when(is_boundary)
        def _masked():
            accumulate(with_row_mask=True)

        @pl.when(jnp.logical_not(is_boundary))
        def _fast():
            accumulate(with_row_mask=False)
    else:
        accumulate(with_row_mask=False)


@functools.partial(jax.jit, static_argnames=("block_bytes",))
def silog_loss(pred, gt, *, block_bytes=4 * 1024 * 1024):
    """pred, gt: (B, H, W) arrays (f32 or bf16). Returns scalar SiLog loss."""
    b, h, w = gt.shape
    n = int(b) * int(h) * int(w)
    pred_flat = pred.reshape(n)     # pred.view(batch, h, w)-equivalent
    gt_flat = gt.reshape(n)

    # Lane-dense slab: (rows, lane) with lane a multiple of 128.
    lane = next((c for c in (512, 256, 128) if n % c == 0), None)
    tail_cnt = tail_s1 = tail_s2 = None
    if lane is None:
        # Element count not a multiple of 128: run the kernel on the largest
        # 128-aligned prefix and fold the short tail in pure JAX (no full pad
        # copy of both inputs).
        lane = 128
        n_main = (n // lane) * lane
        pred_tail = pred_flat[n_main:].astype(jnp.float32)
        gt_tail = gt_flat[n_main:].astype(jnp.float32)
        tmask = (gt_tail > 0.0) & (pred_tail > 0.0)
        tld = jnp.where(tmask,
                        jnp.log(jnp.where(tmask, pred_tail, 1.0))
                        - jnp.log(jnp.where(tmask, gt_tail, 1.0)),
                        0.0)
        tail_cnt = jnp.sum(tmask.astype(jnp.float32))
        tail_s1 = jnp.sum(tld * tld)
        tail_s2 = jnp.sum(tld)
        pred_flat = pred_flat[:n_main]
        gt_flat = gt_flat[:n_main]
        n = n_main

    if n == 0:
        cnt, s1, s2 = tail_cnt, tail_s1, tail_s2
    else:
        rows = n // lane
        pred2d = pred_flat.reshape(rows, lane)
        gt2d = gt_flat.reshape(rows, lane)

        # ~block_bytes per input block (default 4 MiB: double-buffered pair of
        # inputs = 16 MiB, comfortable on v7x's 64 MiB VMEM, >=85% roofline).
        target_rows = max(8, block_bytes // (lane * 4))
        if rows >= 8:
            row_tile = max(8, (min(target_rows, rows) // 8) * 8)
        else:
            row_tile = rows
        acc_rows = 8 if row_tile % 8 == 0 else row_tile
        n_groups = row_tile // acc_rows

        n_blocks = pl.cdiv(rows, row_tile)
        n_split = _num_tensorcores() if n_blocks >= 2 else 1
        blocks_per_split = pl.cdiv(n_blocks, n_split)
        need_row_mask = (rows % row_tile != 0) or (
            n_split * blocks_per_split != n_blocks)

        def in_map(s, j):
            # Clamp overflow logical blocks in-bounds; their contribution is
            # zeroed by the in-kernel row-index mask.
            return (jnp.minimum(s * blocks_per_split + j, n_blocks - 1), 0)

        out_map = lambda s, j: (s, 0)
        partial_shape = jax.ShapeDtypeStruct((n_split * acc_rows, lane),
                                             jnp.float32)

        kernel = functools.partial(
            _silog_partial_kernel, rows=rows, row_tile=row_tile, lane=lane,
            blocks_per_split=blocks_per_split, acc_rows=acc_rows,
            need_row_mask=need_row_mask, unroll=min(4, max(1, n_groups)))

        cnt_p, s1_p, s2_p = pl.pallas_call(
            kernel,
            out_shape=(partial_shape, partial_shape, partial_shape),
            grid_spec=pltpu.PrefetchScalarGridSpec(
                num_scalar_prefetch=0,
                grid=(n_split, blocks_per_split),
                in_specs=[
                    pl.BlockSpec((row_tile, lane), in_map),
                    pl.BlockSpec((row_tile, lane), in_map),
                ],
                out_specs=[
                    pl.BlockSpec((acc_rows, lane), out_map),
                    pl.BlockSpec((acc_rows, lane), out_map),
                    pl.BlockSpec((acc_rows, lane), out_map),
                ],
            ),
            compiler_params=pltpu.CompilerParams(
                dimension_semantics=("parallel", "arbitrary"),
                vmem_limit_bytes=48 * 1024 * 1024,
            ),
        )(pred2d, gt2d)

        cnt = jnp.sum(cnt_p)
        s1 = jnp.sum(s1_p)
        s2 = jnp.sum(s2_p)
        if tail_cnt is not None:
            cnt = cnt + tail_cnt
            s1 = s1 + tail_s1
            s2 = s2 + tail_s2

    # If no pixel satisfies (gt > 0) & (pred > 0), cnt == 0 and the result is
    # NaN — same as torch's mean() over an empty selection.
    mean_sq = s1 / cnt                 # mean(log_diff ** 2)
    mean = s2 / cnt                    # mean(log_diff)
    # torch computes sqrt(silog1 - silog2) directly; the clamp only guards
    # against tiny negative values from fp cancellation (the true value is
    # mathematically >= (1 - variance_focus) * mean_sq >= 0).
    return jnp.sqrt(jnp.maximum(mean_sq - VARIANCE_FOCUS * mean * mean, 0.0)) * SCALE


def _silog_ref(pred, gt):
    mask = (gt > 0.0) & (pred > 0.0)
    ld = jnp.where(mask,
                   jnp.log(jnp.where(mask, pred, 1.0))
                   - jnp.log(jnp.where(mask, gt, 1.0)), 0.0)
    cnt = jnp.sum(mask)
    silog1 = jnp.sum(ld * ld) / cnt
    silog2 = VARIANCE_FOCUS * (jnp.sum(ld) / cnt) ** 2
    return jnp.sqrt(silog1 - silog2) * SCALE


if __name__ == "__main__":
    key = jax.random.PRNGKey(0)
    k1, k2, k3 = jax.random.split(key, 3)

    # Small test (single-block path), matching the module's (B, H, W) inputs.
    B, H, W = 2, 16, 16
    pred = jax.random.uniform(k1, (B, H, W), jnp.float32, minval=0.5, maxval=10.0)
    gt = jax.random.uniform(k2, (B, H, W), jnp.float32, minval=0.5, maxval=10.0)
    invalid = jax.random.uniform(k3, (B, H, W), jnp.float32) < 0.2
    gt = jnp.where(invalid, 0.0, gt)

    loss = jax.block_until_ready(silog_loss(pred, gt))
    ref = jax.block_until_ready(_silog_ref(pred, gt))
    assert jnp.allclose(loss, ref, rtol=1e-5, atol=1e-5), (loss, ref)

    # Depth-map-sized test: exercises the strip-mined group loop.
    kb1, kb2, kb3 = jax.random.split(jax.random.PRNGKey(1), 3)
    B2, H2, W2 = 2, 640, 480
    pred2 = jax.random.uniform(kb1, (B2, H2, W2), jnp.float32, minval=0.1, maxval=20.0)
    gt2 = jax.random.uniform(kb2, (B2, H2, W2), jnp.float32, minval=0.1, maxval=20.0)
    gt2 = jnp.where(jax.random.uniform(kb3, (B2, H2, W2), jnp.float32) < 0.3, 0.0, gt2)

    loss2 = jax.block_until_ready(silog_loss(pred2, gt2))
    ref2 = jax.block_until_ready(_silog_ref(pred2, gt2))
    assert jnp.allclose(loss2, ref2, rtol=1e-3, atol=1e-3), (loss2, ref2)

    # Same data with tiny blocks: exercises multi-block pipelining, the core
    # split (when 2 TCs are detected) and the boundary-gated row mask.
    loss3 = jax.block_until_ready(silog_loss(pred2, gt2, block_bytes=64 * 1024))
    assert jnp.allclose(loss3, ref2, rtol=1e-3, atol=1e-3), (loss3, ref2)

    # Element count not a multiple of 128: exercises the prefix + pure-JAX
    # tail path and the ragged last-block mask.
    kc1, kc2, kc3 = jax.random.split(jax.random.PRNGKey(2), 3)
    B4, H4, W4 = 2, 7, 93                      # n = 1302 -> 1280 main + 22 tail
    pred4 = jax.random.uniform(kc1, (B4, H4, W4), jnp.float32, minval=0.1, maxval=5.0)
    gt4 = jax.random.uniform(kc2, (B4, H4, W4), jnp.float32, minval=0.1, maxval=5.0)
    gt4 = jnp.where(jax.random.uniform(kc3, (B4, H4, W4), jnp.float32) < 0.25, 0.0, gt4)

    loss4 = jax.block_until_ready(silog_loss(pred4, gt4))
    ref4 = jax.block_until_ready(_silog_ref(pred4, gt4))
    assert jnp.allclose(loss4, ref4, rtol=1e-4, atol=1e-4), (loss4, ref4)

    print("KERNEL_OK")
</pallas_src>

<mosaic_0001>
module attributes {stable_mosaic.version = 11 : i64} {
  func.func @_silog_partial_kernel(%arg0: i32, %arg1: i32, %arg2: memref<1x512xf32, #tpu.memory_space<vmem>>, %arg3: memref<1x512xf32, #tpu.memory_space<vmem>>, %arg4: memref<1x512xf32, #tpu.memory_space<vmem>>, %arg5: memref<1x512xf32, #tpu.memory_space<vmem>>, %arg6: memref<1x512xf32, #tpu.memory_space<vmem>>) attributes {dimension_semantics = [#tpu.dimension_semantics<parallel>, #tpu.dimension_semantics<arbitrary>], iteration_bounds = array<i64: 1, 1>, scalar_prefetch = 0 : i64, scratch_operands = 0 : i64, tpu.core_type = #tpu.core_type<tc>, window_params = [{transform_indices = @transform_0, window_bounds = array<i64: 1, 512>}, {transform_indices = @transform_1, window_bounds = array<i64: 1, 512>}, {transform_indices = @transform_2, window_bounds = array<i64: 1, 512>}, {transform_indices = @transform_3, window_bounds = array<i64: 1, 512>}, {transform_indices = @transform_4, window_bounds = array<i64: 1, 512>}]} {
    %c0_i32 = arith.constant 0 : i32
    %0 = arith.cmpi eq, %arg1, %c0_i32 : i32
    %1 = arith.extui %0 : i1 to i32
    %c0_i32_0 = arith.constant 0 : i32
    %2 = arith.cmpi ne, %1, %c0_i32_0 : i32
    scf.if %2 {
      %cst_21 = arith.constant 0.000000e+00 : f32
      %39 = vector.broadcast %cst_21 : f32 to vector<1x512xf32>
      %c0_22 = arith.constant 0 : index
      %c0_23 = arith.constant 0 : index
      %40 = vector.load %arg4[%c0_22, %c0_23] : memref<1x512xf32, #tpu.memory_space<vmem>>, vector<1x512xf32>
      tpu.vector_store %arg4[%c0_22, %c0_23], %39 {strides = array<i32>} : memref<1x512xf32, #tpu.memory_space<vmem>>, vector<1x512xf32>,
      %cst_24 = arith.constant 0.000000e+00 : f32
      %41 = vector.broadcast %cst_24 : f32 to vector<1x512xf32>
      %c0_25 = arith.constant 0 : index
      %c0_26 = arith.constant 0 : index
      %42 = vector.load %arg5[%c0_25, %c0_26] : memref<1x512xf32, #tpu.memory_space<vmem>>, vector<1x512xf32>
      tpu.vector_store %arg5[%c0_25, %c0_26], %41 {strides = array<i32>} : memref<1x512xf32, #tpu.memory_space<vmem>>, vector<1x512xf32>,
      %cst_27 = arith.constant 0.000000e+00 : f32
      %43 = vector.broadcast %cst_27 : f32 to vector<1x512xf32>
      %c0_28 = arith.constant 0 : index
      %c0_29 = arith.constant 0 : index
      %44 = vector.load %arg6[%c0_28, %c0_29] : memref<1x512xf32, #tpu.memory_space<vmem>>, vector<1x512xf32>
      tpu.vector_store %arg6[%c0_28, %c0_29], %43 {strides = array<i32>} : memref<1x512xf32, #tpu.memory_space<vmem>>, vector<1x512xf32>,
    } else {
    }
    %cst = arith.constant 0.000000e+00 : f32
    %3 = vector.broadcast %cst : f32 to vector<1x512xf32>
    %c0_i32_1 = arith.constant 0 : i32
    %c1_i32 = arith.constant 1 : i32
    %4 = arith.muli %c0_i32_1, %c1_i32 : i32
    %5 = tpu.assume_multiple %4, 1 : i32
    %6 = arith.index_cast %5 : i32 to index
    %c0 = arith.constant 0 : index
    %7 = vector.load %arg2[%6, %c0] : memref<1x512xf32, #tpu.memory_space<vmem>>, vector<1x512xf32>
    %8 = arith.index_cast %5 : i32 to index
    %c0_2 = arith.constant 0 : index
    %9 = vector.load %arg3[%8, %c0_2] : memref<1x512xf32, #tpu.memory_space<vmem>>, vector<1x512xf32>
    %cst_3 = arith.constant 0.000000e+00 : f32
    %10 = vector.broadcast %cst_3 : f32 to vector<1x512xf32>
    %11 = arith.cmpf ogt, %9, %10 : vector<1x512xf32>
    %cst_4 = arith.constant 0.000000e+00 : f32
    %12 = vector.broadcast %cst_4 : f32 to vector<1x512xf32>
    %13 = arith.cmpf ogt, %7, %12 : vector<1x512xf32>
    %14 = arith.andi %11, %13 : vector<1x512xi1>
    %cst_5 = arith.constant 1.000000e+00 : f32
    %15 = vector.broadcast %cst_5 : f32 to vector<1x512xf32>
    %16 = arith.select %14, %7, %15 : vector<1x512xi1>, vector<1x512xf32>
    %17 = math.log %16 : vector<1x512xf32>
    %cst_6 = arith.constant 1.000000e+00 : f32
    %18 = vector.broadcast %cst_6 : f32 to vector<1x512xf32>
    %19 = arith.select %14, %9, %18 : vector<1x512xi1>, vector<1x512xf32>
    %20 = math.log %19 : vector<1x512xf32>
    %21 = arith.subf %17, %20 : vector<1x512xf32>
    %cst_7 = arith.constant 0.000000e+00 : f32
    %22 = vector.broadcast %cst_7 : f32 to vector<1x512xf32>
    %23 = arith.select %14, %21, %22 : vector<1x512xi1>, vector<1x512xf32>
    %24 = arith.extui %14 : vector<1x512xi1> to vector<1x512xi32>
    %25 = arith.sitofp %24 : vector<1x512xi32> to vector<1x512xf32>
    %26 = arith.addf %3, %25 : vector<1x512xf32>
    %27 = arith.mulf %23, %23 : vector<1x512xf32>
    %28 = arith.addf %3, %27 : vector<1x512xf32>
    %29 = arith.addf %3, %23 : vector<1x512xf32>
    %c1_i32_8 = arith.constant 1 : i32
    %c0_9 = arith.constant 0 : index
    %c0_10 = arith.constant 0 : index
    %30 = vector.load %arg4[%c0_9, %c0_10] : memref<1x512xf32, #tpu.memory_space<vmem>>, vector<1x512xf32>
    %31 = arith.addf %30, %26 : vector<1x512xf32>
    %c0_11 = arith.constant 0 : index
    %c0_12 = arith.constant 0 : index
    %32 = vector.load %arg4[%c0_11, %c0_12] : memref<1x512xf32, #tpu.memory_space<vmem>>, vector<1x512xf32>
    tpu.vector_store %arg4[%c0_11, %c0_12], %31 {strides = array<i32>} : memref<1x512xf32, #tpu.memory_space<vmem>>, vector<1x512xf32>,
    %c0_13 = arith.constant 0 : index
    %c0_14 = arith.constant 0 : index
    %33 = vector.load %arg5[%c0_13, %c0_14] : memref<1x512xf32, #tpu.memory_space<vmem>>, vector<1x512xf32>
    %34 = arith.addf %33, %28 : vector<1x512xf32>
    %c0_15 = arith.constant 0 : index
    %c0_16 = arith.constant 0 : index
    %35 = vector.load %arg5[%c0_15, %c0_16] : memref<1x512xf32, #tpu.memory_space<vmem>>, vector<1x512xf32>
    tpu.vector_store %arg5[%c0_15, %c0_16], %34 {strides = array<i32>} : memref<1x512xf32, #tpu.memory_space<vmem>>, vector<1x512xf32>,
    %c0_17 = arith.constant 0 : index
    %c0_18 = arith.constant 0 : index
    %36 = vector.load %arg6[%c0_17, %c0_18] : memref<1x512xf32, #tpu.memory_space<vmem>>, vector<1x512xf32>
    %37 = arith.addf %36, %29 : vector<1x512xf32>
    %c0_19 = arith.constant 0 : index
    %c0_20 = arith.constant 0 : index
    %38 = vector.load %arg6[%c0_19, %c0_20] : memref<1x512xf32, #tpu.memory_space<vmem>>, vector<1x512xf32>
    tpu.vector_store %arg6[%c0_19, %c0_20], %37 {strides = array<i32>} : memref<1x512xf32, #tpu.memory_space<vmem>>, vector<1x512xf32>,
    return
  }
  func.func @transform_0(%arg0: i32, %arg1: i32) -> (i32, i32) {
    %c1_i32 = arith.constant 1 : i32
    %0 = arith.muli %arg0, %c1_i32 : i32
    %1 = arith.addi %0, %arg1 : i32
    %c0_i32 = arith.constant 0 : i32
    %2 = arith.minsi %1, %c0_i32 : i32
    %c0_i32_0 = arith.constant 0 : i32
    %c0_i32_1 = arith.constant 0 : i32
    return %2, %c0_i32_0 : i32, i32
  }
  func.func @transform_1(%arg0: i32, %arg1: i32) -> (i32, i32) {
    %c1_i32 = arith.constant 1 : i32
    %0 = arith.muli %arg0, %c1_i32 : i32
    %1 = arith.addi %0, %arg1 : i32
    %c0_i32 = arith.constant 0 : i32
    %2 = arith.minsi %1, %c0_i32 : i32
    %c0_i32_0 = arith.constant 0 : i32
    %c0_i32_1 = arith.constant 0 : i32
    return %2, %c0_i32_0 : i32, i32
  }
  func.func @transform_2(%arg0: i32, %arg1: i32) -> (i32, i32) {
    %c0_i32 = arith.constant 0 : i32
    %c0_i32_0 = arith.constant 0 : i32
    return %arg0, %c0_i32 : i32, i32
  }
  func.func @transform_3(%arg0: i32, %arg1: i32) -> (i32, i32) {
    %c0_i32 = arith.constant 0 : i32
    %c0_i32_0 = arith.constant 0 : i32
    return %arg0, %c0_i32 : i32, i32
  }
  func.func @transform_4(%arg0: i32, %arg1: i32) -> (i32, i32) {
    %c0_i32 = arith.constant 0 : i32
    %c0_i32_0 = arith.constant 0 : i32
    return %arg0, %c0_i32 : i32, i32
  }
}

</mosaic_0001>

<bundles_post_ra>
// kernel: silog_loss.1
= control target key start
LH: loop header
LB: loop body
LE: loop exit
PB: predicated region body
PF: predicated region fallthrough
CT: control target
= control target key end

     0   :  { %v72_v0 = vlaneseq  ;;  %v144_v4 = vmov 0.0   ;;  %s231_s0 = inlined_call_operand.vmem [shape: f32[1,512], index: 0, kind: input, shape index: {}]   ;;  %s232_s1 = inlined_call_operand.vmem [shape: f32[1,512], index: 1, kind: input, shape index: {}]   ;;  %s233_s2 = inlined_call_operand.vmem [shape: f32[1,512], index: 2, kind: output, shape index: {0}]   ;;  %s234_s3 = inlined_call_operand.vmem [shape: f32[1,512], index: 3, kind: output, shape index: {1}]   ;;  %s235_s4 = inlined_call_operand.vmem [shape: f32[1,512], index: 4, kind: output, shape index: {2}]  }
   0x1   :  { %v81_v1 = vld [vmem:[%s231_s0] sm:$0xf] }
   0x2   :  { %v83_v2 = vld [vmem:[%s232_s1] sm:$0xf]  ;;  %vm176_vm0 = vcmp.lt.s32.totalorder %v72_v0, 512  ;;  %vm85_vm2 = vcmp.gt.f32.partialorder %v81_v1, 0.0 }
   0x3   :  { %vm84_vm1 = vcmp.gt.f32.partialorder %v83_v2, 0.0  ;;  %76 = vst.msk [vmem:[%s233_s2] sm:$0xf] %vm176_vm0, %v144_v4  ;;  %77 = vst.msk [vmem:[%s234_s3] sm:$0xf] %vm176_vm0, %v144_v4 }
   0x4   :  { %vm185_vm3 = vmand %vm84_vm1, %vm85_vm2  ;;  %78 = vst.msk [vmem:[%s235_s4] sm:$0xf] %vm176_vm0, %v144_v4 }
   0x5   :  { %v87_v6 = vsel %vm185_vm3, %v81_v1, 1.0  ;;  %v90_v7 = vsel %vm185_vm3, %v83_v2, 1.0  ;;  %v138_v8 = vsel %vm185_vm3, 1.0, %v144_v4 }
   0x6   :  { %140 = vlog2.f32 %v87_v6 }
   0x7   :  { %142 = vlog2.f32 %v90_v7 }
   0xa   :  { %v101_v9 = vld [vmem:[%s233_s2] sm:$0xf] }
   0xb   :  { %v102_v10 = vadd.f32 %v138_v8, %v101_v9  ;;  %v111_v16 = vld [vmem:[%s235_s4] sm:$0xf] }
   0xc   :  { %v108_v18 = vld [vmem:[%s234_s3] sm:$0xf] }
   0xd   :  { %107 = vst.msk [vmem:[%s233_s2] sm:$0xf] %vm176_vm0, %v102_v10 }
  0x13   :  { %v141_v11 = vpop.eup %140 }
  0x14   :  { %v143_v12 = vpop.eup %142  ;;  %v89_v13 = vmul.f32 0.6931472, %v141_v11 }
  0x15   :  { %v92_v14 = vmul.f32 0.6931472, %v143_v12 }
  0x17   :  { %v93_v15 = vsub.f32 %v89_v13, %v92_v14 }
  0x19   :  { %v94_v17 = vsel %vm185_vm3, %v93_v15, 0.0 }
  0x1a   :  { %v98_v19 = vmul.f32 %v94_v17, %v94_v17  ;;  %v112_v20 = vadd.f32 %v111_v16, %v94_v17 }
  0x1c   :  { %v109_v21 = vadd.f32 %v108_v18, %v98_v19  ;;  %113 = vst.msk [vmem:[%s235_s4] sm:$0xf] %vm176_vm0, %v112_v20 }
  0x1e   :  { %110 = vst.msk [vmem:[%s234_s3] sm:$0xf] %vm176_vm0, %v109_v21 }

</bundles_post_ra>
